<compile_context>
chip_gen: v6e
topology: v6e:2x2x1
jax: 0.10.0
libtpu: 0.0.40
codegen_flags: <defaults>
</compile_context>

<pallas_src>
import math

import jax
import jax.numpy as jnp
from jax.experimental import pallas as pl
from jax.experimental.pallas import tpu as pltpu


OUT_PAD = 8  # final layer padded 3 -> 8 output columns (sublane-aligned)


def _round_up(n, m):
    return ((n + m - 1) // m) * m


def anncsgd_kernel(x_ref, w1_ref, b1_ref, w2_ref, b2_ref, w3_ref, b3_ref, o_ref):
    """One batch tile of the MLP forward. Weights/biases stay VMEM-resident."""
    x = x_ref[...]

    # Layer 1: Linear + LeakyReLU(0.01). MXU in the weights' dtype, f32 acc.
    h1 = jnp.dot(x, w1_ref[...], preferred_element_type=jnp.float32) + b1_ref[...]
    h1 = jnp.maximum(h1, 0.01 * h1)

    # Layer 2: Linear + LeakyReLU(0.01)
    h2 = jnp.dot(h1.astype(w2_ref.dtype), w2_ref[...],
                 preferred_element_type=jnp.float32) + b2_ref[...]
    h2 = jnp.maximum(h2, 0.01 * h2)

    # Output layer: Linear + Softplus (PyTorch default: beta=1, threshold=20).
    z = jnp.dot(h2.astype(w3_ref.dtype), w3_ref[...],
                preferred_element_type=jnp.float32) + b3_ref[...]
    sp = jnp.where(z > 20.0, z, jnp.log1p(jnp.exp(jnp.minimum(z, 20.0))))

    o_ref[...] = sp.astype(o_ref.dtype)


def anncsgd_forward(x, params, *, b_tile=2048, use_bf16=True):
    """ANNCSGD forward with a batch-tiled pallas_call.

    x: [B, 25] float32.  params: (w1, b1, w2, b2, w3, b3), weights stored as
    (in_features, out_features), biases as (1, out_features), all float32.
    """
    w1, b1, w2, b2, w3, b3 = params
    B, F = x.shape
    out_dim = w3.shape[1]

    # Small output padding (3 -> 8 columns): ~16x fewer HBM write bytes than
    # padding to 128 lanes.  Wrapper slices the dead columns off at the end.
    w3p = jnp.pad(w3, ((0, 0), (0, OUT_PAD - out_dim)))
    b3p = jnp.pad(b3, ((0, 0), (0, OUT_PAD - out_dim)))

    if use_bf16:
        # bf16 feeds only the MXU; accumulation / activations remain f32.
        x = x.astype(jnp.bfloat16)
        w1 = w1.astype(jnp.bfloat16)
        w2 = w2.astype(jnp.bfloat16)
        w3p = w3p.astype(jnp.bfloat16)

    # Batch tile: sublane-aligned, never larger than the padded batch.
    bt = min(b_tile, _round_up(B, 8))
    bt = _round_up(bt, 8)
    # v7x has 2 TensorCores: prefer >= 2 grid steps when the batch allows it.
    while bt > 8 and pl.cdiv(B, bt) < 2:
        bt = _round_up(max(bt // 2, 8), 8)

    Bp = _round_up(B, bt)
    if Bp != B:
        x = jnp.pad(x, ((0, Bp - B), (0, 0)))

    grid = (Bp // bt,)

    def resident(shape):
        # Same block index every grid step -> DMA'd once, stays VMEM-resident.
        return pl.BlockSpec(shape, lambda i: (0, 0))

    out = pl.pallas_call(
        anncsgd_kernel,
        out_shape=jax.ShapeDtypeStruct((Bp, OUT_PAD), jnp.float32),
        grid_spec=pl.GridSpec(
            grid=grid,
            in_specs=[
                # Full-width, contiguous x rows (no lane padding in HBM).
                pl.BlockSpec((bt, F), lambda i: (i, 0)),
                resident(w1.shape), resident(b1.shape),
                resident(w2.shape), resident(b2.shape),
                resident(w3p.shape), resident(b3p.shape),
            ],
            out_specs=pl.BlockSpec((bt, OUT_PAD), lambda i: (i, 0)),
        ),
        compiler_params=pltpu.CompilerParams(
            dimension_semantics=("parallel",),
        ),
    )(x, w1, b1, w2, b2, w3p, b3p)

    # Padded batch rows and padded output columns are dead -> slice them off.
    return out[:B, :out_dim]


def init_params(key, input_dim=25, hidden_dims=(64, 32), out_dim=3):
    """Deterministic init mimicking nn.Linear's U(-1/sqrt(fan_in), 1/sqrt(fan_in))."""
    dims = [input_dim] + list(hidden_dims) + [out_dim]
    params = []
    keys = jax.random.split(key, 2 * (len(dims) - 1))
    for li, (d_in, d_out) in enumerate(zip(dims[:-1], dims[1:])):
        bound = 1.0 / math.sqrt(d_in)
        w = jax.random.uniform(keys[2 * li], (d_in, d_out),
                               minval=-bound, maxval=bound, dtype=jnp.float32)
        b = jax.random.uniform(keys[2 * li + 1], (1, d_out),
                               minval=-bound, maxval=bound, dtype=jnp.float32)
        params.extend([w, b])
    return tuple(params)


def _reference(x, params, cast_dtype=None):
    """Pure-JAX reference. cast_dtype=bfloat16 mirrors the kernel's MXU inputs."""
    w1, b1, w2, b2, w3, b3 = params
    c = (lambda a: a.astype(cast_dtype)) if cast_dtype is not None else (lambda a: a)
    h1 = jnp.dot(c(x), c(w1), preferred_element_type=jnp.float32) + b1
    h1 = jnp.maximum(h1, 0.01 * h1)
    h2 = jnp.dot(c(h1), c(w2), preferred_element_type=jnp.float32) + b2
    h2 = jnp.maximum(h2, 0.01 * h2)
    z = jnp.dot(c(h2), c(w3), preferred_element_type=jnp.float32) + b3
    return jnp.where(z > 20.0, z, jnp.log1p(jnp.exp(jnp.minimum(z, 20.0))))


# TODO(synk): fit()/predict() (AdamW training loop, CRPS/Brier metrics) are
# host-side training utilities, not part of the forward kernel.

if __name__ == "__main__":
    key = jax.random.PRNGKey(0)
    k_x1, k_x2, k_x3, k_p = jax.random.split(key, 4)

    INPUT_DIM = 25
    params = init_params(k_p, input_dim=INPUT_DIM, hidden_dims=(64, 32), out_dim=3)

    # Case 1: tiny batch, pure-f32 path (tight tolerance).
    B1 = 8
    x1 = jax.random.normal(k_x1, (B1, INPUT_DIM), dtype=jnp.float32)
    out1 = jax.block_until_ready(anncsgd_forward(x1, params, use_bf16=False))
    ref1 = _reference(x1, params)
    assert out1.shape == (B1, 3)
    assert bool(jnp.allclose(out1, ref1, atol=1e-5, rtol=1e-5))

    # Case 2: batch not a multiple of the tile -> exercises batch tiling,
    # padding, multi-step grid, and the bf16 MXU-input path.
    B2 = 200
    x2 = jax.random.normal(k_x2, (B2, INPUT_DIM), dtype=jnp.float32)
    out2 = jax.block_until_ready(anncsgd_forward(x2, params, b_tile=64))
    ref2_bf16 = _reference(x2, params, cast_dtype=jnp.bfloat16)
    ref2_f32 = _reference(x2, params)
    assert out2.shape == (B2, 3)
    assert bool(jnp.allclose(out2, ref2_bf16, atol=1e-4, rtol=1e-4))
    assert bool(jnp.allclose(out2, ref2_f32, atol=5e-2, rtol=5e-2))

    # Case 3: default tile -> exercises the ">=2 grid steps" guard (256 -> 128).
    B3 = 256
    x3 = jax.random.normal(k_x3, (B3, INPUT_DIM), dtype=jnp.float32)
    out3 = jax.block_until_ready(anncsgd_forward(x3, params))
    ref3_bf16 = _reference(x3, params, cast_dtype=jnp.bfloat16)
    assert out3.shape == (B3, 3)
    assert bool(jnp.allclose(out3, ref3_bf16, atol=1e-4, rtol=1e-4))

    print("KERNEL_OK")
</pallas_src>

<mosaic_0001>
module attributes {stable_mosaic.version = 11 : i64} {
  func.func @anncsgd_kernel(%arg0: i32, %arg1: memref<8x25xf32, #tpu.memory_space<vmem>>, %arg2: memref<25x64xf32, #tpu.memory_space<vmem>>, %arg3: memref<1x64xf32, #tpu.memory_space<vmem>>, %arg4: memref<64x32xf32, #tpu.memory_space<vmem>>, %arg5: memref<1x32xf32, #tpu.memory_space<vmem>>, %arg6: memref<32x8xf32, #tpu.memory_space<vmem>>, %arg7: memref<1x8xf32, #tpu.memory_space<vmem>>, %arg8: memref<8x8xf32, #tpu.memory_space<vmem>>) attributes {dimension_semantics = [#tpu.dimension_semantics<parallel>], iteration_bounds = array<i64: 1>, scalar_prefetch = 0 : i64, scratch_operands = 0 : i64, tpu.core_type = #tpu.core_type<tc>, window_params = [{transform_indices = @transform_0, window_bounds = array<i64: 8, 25>}, {pipeline_mode = #tpu.pipeline_mode<synchronous>, transform_indices = @transform_1, window_bounds = array<i64: 25, 64>}, {pipeline_mode = #tpu.pipeline_mode<synchronous>, transform_indices = @transform_2, window_bounds = array<i64: 1, 64>}, {pipeline_mode = #tpu.pipeline_mode<synchronous>, transform_indices = @transform_3, window_bounds = array<i64: 64, 32>}, {pipeline_mode = #tpu.pipeline_mode<synchronous>, transform_indices = @transform_4, window_bounds = array<i64: 1, 32>}, {pipeline_mode = #tpu.pipeline_mode<synchronous>, transform_indices = @transform_5, window_bounds = array<i64: 32, 8>}, {pipeline_mode = #tpu.pipeline_mode<synchronous>, transform_indices = @transform_6, window_bounds = array<i64: 1, 8>}, {transform_indices = @transform_7, window_bounds = array<i64: 8, 8>}]} {
    %c0 = arith.constant 0 : index
    %c0_0 = arith.constant 0 : index
    %0 = vector.load %arg1[%c0, %c0_0] : memref<8x25xf32, #tpu.memory_space<vmem>>, vector<8x25xf32>
    %c0_1 = arith.constant 0 : index
    %c0_2 = arith.constant 0 : index
    %1 = vector.load %arg2[%c0_1, %c0_2] : memref<25x64xf32, #tpu.memory_space<vmem>>, vector<25x64xf32>
    %cst = arith.constant dense<0.000000e+00> : vector<8x64xf32>
    %2 = tpu.matmul %0, %1, %cst {dimension_numbers = #tpu.dot_dimension_numbers<[1], [0], [0], [1], [0, 0, 1, 1], [], []>} : vector<8x25xf32>, vector<25x64xf32>, vector<8x64xf32> -> vector<8x64xf32>
    %c0_3 = arith.constant 0 : index
    %c0_4 = arith.constant 0 : index
    %3 = vector.load %arg3[%c0_3, %c0_4] : memref<1x64xf32, #tpu.memory_space<vmem>>, vector<1x64xf32>
    %4 = vector.broadcast %3 : vector<1x64xf32> to vector<8x64xf32>
    %5 = arith.addf %2, %4 : vector<8x64xf32>
    %cst_5 = arith.constant 0.00999999977 : f32
    %6 = vector.broadcast %cst_5 : f32 to vector<8x64xf32>
    %7 = arith.mulf %6, %5 : vector<8x64xf32>
    %8 = arith.maximumf %5, %7 : vector<8x64xf32>
    %c0_6 = arith.constant 0 : index
    %c0_7 = arith.constant 0 : index
    %9 = vector.load %arg4[%c0_6, %c0_7] : memref<64x32xf32, #tpu.memory_space<vmem>>, vector<64x32xf32>
    %cst_8 = arith.constant dense<0.000000e+00> : vector<8x32xf32>
    %10 = tpu.matmul %8, %9, %cst_8 {dimension_numbers = #tpu.dot_dimension_numbers<[1], [0], [0], [1], [0, 0, 1, 1], [], []>} : vector<8x64xf32>, vector<64x32xf32>, vector<8x32xf32> -> vector<8x32xf32>
    %c0_9 = arith.constant 0 : index
    %c0_10 = arith.constant 0 : index
    %11 = vector.load %arg5[%c0_9, %c0_10] : memref<1x32xf32, #tpu.memory_space<vmem>>, vector<1x32xf32>
    %12 = vector.broadcast %11 : vector<1x32xf32> to vector<8x32xf32>
    %13 = arith.addf %10, %12 : vector<8x32xf32>
    %cst_11 = arith.constant 0.00999999977 : f32
    %14 = vector.broadcast %cst_11 : f32 to vector<8x32xf32>
    %15 = arith.mulf %14, %13 : vector<8x32xf32>
    %16 = arith.maximumf %13, %15 : vector<8x32xf32>
    %c0_12 = arith.constant 0 : index
    %c0_13 = arith.constant 0 : index
    %17 = vector.load %arg6[%c0_12, %c0_13] : memref<32x8xf32, #tpu.memory_space<vmem>>, vector<32x8xf32>
    %cst_14 = arith.constant dense<0.000000e+00> : vector<8x8xf32>
    %18 = tpu.matmul %16, %17, %cst_14 {dimension_numbers = #tpu.dot_dimension_numbers<[1], [0], [0], [1], [0, 0, 1, 1], [], []>} : vector<8x32xf32>, vector<32x8xf32>, vector<8x8xf32> -> vector<8x8xf32>
    %c0_15 = arith.constant 0 : index
    %c0_16 = arith.constant 0 : index
    %19 = vector.load %arg7[%c0_15, %c0_16] : memref<1x8xf32, #tpu.memory_space<vmem>>, vector<1x8xf32>
    %20 = vector.broadcast %19 : vector<1x8xf32> to vector<8x8xf32>
    %21 = arith.addf %18, %20 : vector<8x8xf32>
    %cst_17 = arith.constant 2.000000e+01 : f32
    %22 = vector.broadcast %cst_17 : f32 to vector<8x8xf32>
    %23 = arith.cmpf ogt, %21, %22 : vector<8x8xf32>
    %cst_18 = arith.constant 2.000000e+01 : f32
    %24 = vector.broadcast %cst_18 : f32 to vector<8x8xf32>
    %25 = arith.minimumf %21, %24 : vector<8x8xf32>
    %26 = math.exp %25 : vector<8x8xf32>
    %27 = math.log1p %26 : vector<8x8xf32>
    %28 = arith.select %23, %21, %27 : vector<8x8xi1>, vector<8x8xf32>
    %c0_19 = arith.constant 0 : index
    %c0_20 = arith.constant 0 : index
    %29 = vector.load %arg8[%c0_19, %c0_20] : memref<8x8xf32, #tpu.memory_space<vmem>>, vector<8x8xf32>
    tpu.vector_store %arg8[%c0_19, %c0_20], %28 {strides = array<i32>} : memref<8x8xf32, #tpu.memory_space<vmem>>, vector<8x8xf32>,
    return
  }
  func.func @transform_0(%arg0: i32) -> (i32, i32) {
    %c0_i32 = arith.constant 0 : i32
    %c0_i32_0 = arith.constant 0 : i32
    return %arg0, %c0_i32 : i32, i32
  }
  func.func @transform_1(%arg0: i32) -> (i32, i32) {
    %c0_i32 = arith.constant 0 : i32
    %c0_i32_0 = arith.constant 0 : i32
    %c0_i32_1 = arith.constant 0 : i32
    return %c0_i32, %c0_i32_0 : i32, i32
  }
  func.func @transform_2(%arg0: i32) -> (i32, i32) {
    %c0_i32 = arith.constant 0 : i32
    %c0_i32_0 = arith.constant 0 : i32
    %c0_i32_1 = arith.constant 0 : i32
    return %c0_i32, %c0_i32_0 : i32, i32
  }
  func.func @transform_3(%arg0: i32) -> (i32, i32) {
    %c0_i32 = arith.constant 0 : i32
    %c0_i32_0 = arith.constant 0 : i32
    %c0_i32_1 = arith.constant 0 : i32
    return %c0_i32, %c0_i32_0 : i32, i32
  }
  func.func @transform_4(%arg0: i32) -> (i32, i32) {
    %c0_i32 = arith.constant 0 : i32
    %c0_i32_0 = arith.constant 0 : i32
    %c0_i32_1 = arith.constant 0 : i32
    return %c0_i32, %c0_i32_0 : i32, i32
  }
  func.func @transform_5(%arg0: i32) -> (i32, i32) {
    %c0_i32 = arith.constant 0 : i32
    %c0_i32_0 = arith.constant 0 : i32
    %c0_i32_1 = arith.constant 0 : i32
    return %c0_i32, %c0_i32_0 : i32, i32
  }
  func.func @transform_6(%arg0: i32) -> (i32, i32) {
    %c0_i32 = arith.constant 0 : i32
    %c0_i32_0 = arith.constant 0 : i32
    %c0_i32_1 = arith.constant 0 : i32
    return %c0_i32, %c0_i32_0 : i32, i32
  }
  func.func @transform_7(%arg0: i32) -> (i32, i32) {
    %c0_i32 = arith.constant 0 : i32
    %c0_i32_0 = arith.constant 0 : i32
    return %arg0, %c0_i32 : i32, i32
  }
}

</mosaic_0001>

<bundles_post_ra>
// kernel: tpu_custom_call.1
= control target key start
LH: loop header
LB: loop body
LE: loop exit
PB: predicated region body
PF: predicated region fallthrough
CT: control target
= control target key end

     0   :  { %vm43_vm0 = vcmask 1040384   ;;  %v421_v1 = vmov 0.0   ;;  %vm422_vm1 = vmmov 0   ;;  %s530_s0 = inlined_call_operand.vmem [shape: f32[8,25], index: 0, kind: input, shape index: {}]   ;;  %s531_s1 = inlined_call_operand.vmem [shape: f32[25,64], index: 1, kind: input, shape index: {}]   ;;  %s532_s2 = inlined_call_operand.vmem [shape: f32[1,64], index: 2, kind: input, shape index: {}]   ;;  %s533_s3 = inlined_call_operand.vmem [shape: f32[64,32], index: 3, kind: input, shape index: {}]   ;;  %s534_s4 = inlined_call_operand.vmem [shape: f32[1,32], index: 4, kind: input, shape index: {}]   ;;  %s535_s5 = inlined_call_operand.vmem [shape: f32[32,8], index: 5, kind: input, shape index: {}]   ;;  %s536_s6 = inlined_call_operand.vmem [shape: f32[1,8], index: 6, kind: input, shape index: {}]   ;;  %s537_s7 = inlined_call_operand.hbm [shape: f32[8,8], index: 7, kind: output, shape index: {}]  }
   0x1   :  { %v31_v0 = vld [vmem:[%s531_s1 + $0x18] sm:$0x1]  ;;  %351 = vmatprep.subr.mxu0 %v421_v1  ;;  %v30_v2 = vld [vmem:[%s531_s1 + $0x10] sm:$0xff]  ;;  %362 = vmatprep.subr.mxu1 %v421_v1  ;;  %v29_v5 = vld [vmem:[%s531_s1 + $0x8] sm:$0xff] }
   0x2   :  { %v126_v3 = vld [vmem:[%s533_s3 + $0x38] sm:$0xff]  ;;  %352 = vmatpush3.msk.msra.mxu0 %vm43_vm0, %v31_v0  ;;  %359 = vmatprep.mubr.msk.f32.mxu0 %vm422_vm1, %v421_v1  ;;  %v125_v4 = vld [vmem:[%s533_s3 + $0x30] sm:$0xff] }
   0x3   :  { %353 = vmatprep.subr.mxu0 %v421_v1  ;;  %363 = vmatpush3.msra.mxu1 %v126_v3 }
   0x4   :  { %12 = vsyncpa [#allocation3], 0  ;;  %354 = vmatpush3.msra.mxu0 %v30_v2  ;;  %364 = vmatprep.subr.mxu1 %v421_v1  ;;  %v124_v6 = vld [vmem:[%s533_s3 + $0x28] sm:$0xff]  ;;  %v28_v7 = vld [vmem:[%s531_s1] sm:$0xff]  ;;  %vm39_vm2 = vcmask 203776   ;;  %vm134_vm3 = vcmask 523264  }
   0x5   :  { %355 = vmatprep.subr.mxu0 %v421_v1  ;;  %365 = vmatpush3.msra.mxu1 %v125_v4  ;;  %v27_v8 = vld [vmem:[%s530_s0] sm:$0xff]  ;;  %v122_v10 = vld [vmem:[%s533_s3 + $0x18] sm:$0xff]  ;;  %v121_v11 = vld [vmem:[%s533_s3 + $0x10] sm:$0xff]  ;;  %vm221_vm4 = vcmask 261120   ;;  %vm309_vm6 = vcmask 64512  }
   0x6   :  { %356 = vmatpush3.msra.mxu0 %v29_v5  ;;  %366 = vmatprep.subr.mxu1 %v421_v1  ;;  %v123_v9 = vld [vmem:[%s533_s3 + $0x20] sm:$0xff]  ;;  %v120_v12 = vld [vmem:[%s533_s3 + $0x8] sm:$0xff]  ;;  %v213_v20 = vld [vmem:[%s535_s5 + $0x18] sm:$0xff] }
   0x7   :  { %357 = vmatprep.subr.mxu0 %v421_v1  ;;  %367 = vmatpush3.msra.mxu1 %v124_v6  ;;  %v119_v13 = vld [vmem:[%s533_s3] sm:$0xff]  ;;  %v212_v21 = vld [vmem:[%s535_s5 + $0x10] sm:$0xff]  ;;  %v211_v22 = vld [vmem:[%s535_s5 + $0x8] sm:$0xff] }
   0x8   :  { %358 = vmatpush3.msra.mxu0 %v28_v7  ;;  %368 = vmatprep.subr.mxu1 %v421_v1  ;;  %v325_v14 = vld [vmem:[%s532_s2] ss:$0 sm:$0xff] }
   0x9   :  { %360 = vmatmul.mubr.msk.f32.vlgmr.msra.gmra.mxu0 %vm39_vm2, %v27_v8  ;;  %369 = vmatpush3.msra.mxu1 %v123_v9  ;;  %v210_v23 = vld [vmem:[%s535_s5] sm:$0xff] }
   0xa   :  { %370 = vmatprep.subr.mxu1 %v421_v1  ;;  %378 = vmatprep.mubr.msk.f32.mxu1 %vm422_vm1, %v421_v1  ;;  %v328_v24 = vld [vmem:[%s534_s4] ss:$0 sm:$0xff]  ;;  %s423_s4 = smov [#allocation2]  }
   0xb   :  { %381 = vmatprep.subr.mxu0 %v421_v1  ;;  %389 = vmatprep.mubr.msk.f32.mxu0 %vm422_vm1, %v421_v1  ;;  %v330_v30 = vld [vmem:[%s536_s6] ss:$0 sm:$0xff]  ;;  %s317_s5 = sshll.u32 %s423_s4, 4  ;;  %s318_s5 = int_to_ptr.vmem [resolvable:$true] %s317_s5 }
   0xc   :  { %371 = vmatpush3.msra.mxu1 %v122_v10  ;;  %382 = vmatpush3.msra.mxu0 %v213_v20  ;;  %s399_s6 = scalar_lea.vmem %s318_s5, 128  ;;  %p404_p1 = scmp.lt.s32.totalorder %s318_s5, %s318_s5 }
   0xd   :  { %372 = vmatprep.subr.mxu1 %v421_v1  ;;  %383 = vmatprep.subr.mxu0 %v421_v1  ;;  %p400_p0 = scmp.ne.s32.totalorder %s318_s5, %s399_s6  ;;  %p405_p2 = scmp.lt.s32.totalorder %s399_s6, %s399_s6 }
   0xe   :  { %373 = vmatpush3.msra.mxu1 %v121_v11  ;;  %384 = vmatpush3.msra.mxu0 %v212_v21 }
   0xf   :  { %374 = vmatprep.subr.mxu1 %v421_v1  ;;  %385 = vmatprep.subr.mxu0 %v421_v1  ;;  %p406_p3 = por %p405_p2, %p404_p1 }
  0x10   :  { %375 = vmatpush3.msra.mxu1 %v120_v12  ;;  %386 = vmatpush3.msra.mxu0 %v211_v22 }
  0x11   :  { %376 = vmatprep.subr.mxu1 %v421_v1  ;;  %387 = vmatprep.subr.mxu0 %v421_v1  ;;  %p407_p4 = pnand %p406_p3, %p400_p0 }
  0x12   :  { %377 = vmatpush3.msra.mxu1 %v119_v13  ;;  %388 = vmatpush3.msra.mxu0 %v210_v23 }
  0xc9   :  { %v113_v15 = vpop.f32.mrf.mxu0 }
  0xca   :  { %v114_v16 = vadd.f32 %v325_v14, %v113_v15 }
  0xcb   :  { %v361_v17 = vpop.f32.mrf.mxu0 }
  0xcc   :  { %v117_v18 = vmul.f32 0.01, %v114_v16 }
  0xce   :  { %v118_v19 = vmax.f32 %v114_v16, %v117_v18 }
  0xd0   :  { %379 = vmatmul.mubr.msk.f32.vlgmr.msra.gmra.mxu1 %vm134_vm3, %v118_v19 }
 0x190   :  { %v204_v25 = vpop.f32.mrf.mxu1 }
 0x191   :  { %v205_v26 = vadd.f32 %v328_v24, %v204_v25 }
 0x192   :  { %v380_v27 = vpop.f32.mrf.mxu1 }
 0x193   :  { %v208_v28 = vmul.f32 0.01, %v205_v26 }
 0x195   :  { %v209_v29 = vmax.f32 %v205_v26, %v208_v28 }
 0x197   :  { %390 = vmatmul.mubr.msk.f32.vlgmr.msra.gmra.mxu0 %vm221_vm4, %v209_v29 }
 0x257   :  { %v291_v31 = vpop.f32.mrf.mxu0 }
 0x258   :  { %v292_v32 = vadd.f32 %v330_v30, %v291_v31 }
 0x259   :  { %v391_v33 = vpop.f32.mrf.mxu0 }
 0x25a   :  { %v296_v34 = vmin.f32 %v292_v32, 20.0  ;;  %vm295_vm7 = vcmp.gt.f32.partialorder %v292_v32, 20.0 }
 0x25c   :  { %v297_v35 = vmul.f32 1.442695, %v296_v34 }
 0x25e   :  { %395 = vpow2.f32 %v297_v35 }
 0x26b   :  { %v396_v36 = vpop.eup %395 }
 0x26c   :  { %v299_v37 = vadd.f32 1.0, %v396_v36  ;;  %v302_v38 = vmul.f32 -0.5, %v396_v36  ;;  %v305_v40 = vand.u32 2147483647, %v396_v36 }
 0x26e   :  { %397 = vlog2.f32 %v299_v37  ;;  %v303_v39 = vadd.f32 1.0, %v302_v38  ;;  %vm306_vm5 = vcmp.lt.f32.partialorder %v305_v40, 0.0004427343 }
 0x270   :  { %v304_v43 = vmul.f32 %v396_v36, %v303_v39 }
 0x27b   :  { %v398_v41 = vpop.eup %397 }
 0x27c   :  { %v301_v42 = vmul.f32 0.6931472, %v398_v41 }
 0x27e   :  { %v307_v44 = vsel %vm306_vm5, %v304_v43, %v301_v42 }
 0x27f   :  { %v308_v45 = vsel %vm295_vm7, %v292_v32, %v307_v44 }
 0x280   :  { %310 = vst.msk [vmem:[#allocation2] sm:$0xff] %vm309_vm6, %v308_v45 }
 0x281   :  { %410 = shalt.err (!%p407_p4)
}
 0x282   :  { %320 = dma.vmem_to_hbm [thread:$0]  %s318_s5, 128, %s537_s7, [#allocation3]  }
 0x283   :  { %419 = dma.done.wait [#allocation3], 128  }
 0x284   :  { %420 = vsyncadd [#allocation3], 4294967168 }
 0x285   :  { %324 = vsyncpa [#allocation3], 1 }

</bundles_post_ra>
